<compile_context>
chip_gen: v7x
topology: tpu7x:2x2x1
jax: 0.10.0
libtpu: 0.0.40
codegen_flags: <defaults>
</compile_context>

<pallas_src>
import functools

import jax
import jax.numpy as jnp
from jax.experimental import pallas as pl
from jax.experimental.pallas import tpu as pltpu


LAYERS = [32, 16, 8]           # autoencoder layer sizes
HIDDEN_CLS = LAYERS[-1] // 2   # classifier hidden width (classifier_arch == 'hidden')
DEFAULT_BLOCK_B = 4096         # batch tile (multiple of 128; large enough to amortize grid overhead)


def _round_up(n, m):
    return ((n + m - 1) // m) * m


def _ae_kernel(x_ref,
               we0_ref, be0_ref, we1_ref, be1_ref,
               wdc_ref, bdc_ref,            # fused [Wd0 | Wc0]      : (8, 20),  (1, 20)
               wdc1_ref, bdc1_ref,          # fused [[Wd1,0],[0,Wc1]]: (20, 33), (1, 33)
               dec_ref, cls_ref, enc_ref,
               *, mxu_bf16):
    f32 = jnp.float32
    op = (lambda a: a.astype(jnp.bfloat16)) if mxu_bf16 else (lambda a: a)

    x = x_ref[...]

    # ----- encoder_loop -----
    h = jnp.dot(op(x), we0_ref[...], preferred_element_type=f32) + be0_ref[...]
    h = jnp.maximum(h, 0.0)                                        # ReLU (afunc)
    enc = jnp.dot(op(h), we1_ref[...], preferred_element_type=f32) + be1_ref[...]
    enc = jnp.maximum(enc, 0.0)                                    # ReLU (afunc)

    # ----- fused decoder-0 + classifier-hidden (both consume `enc`) -----
    dc = jnp.dot(op(enc), wdc_ref[...], preferred_element_type=f32) + bdc_ref[...]
    dc = jnp.maximum(dc, 0.0)                                      # ReLU (afunc)

    # ----- fused decoder-final + classifier-final (block-diagonal weight) -----
    y = jnp.dot(op(dc), wdc1_ref[...], preferred_element_type=f32) + bdc1_ref[...]
    dec = jax.nn.sigmoid(y[:, :LAYERS[0]])                         # decoder Sigmoid (cols 0:32)
    cls = y[:, LAYERS[0]:]                                         # classifier output (col 32)

    dec_ref[...] = dec.astype(dec_ref.dtype)
    cls_ref[...] = cls.astype(cls_ref.dtype)
    enc_ref[...] = enc.astype(enc_ref.dtype)


@functools.partial(jax.jit, static_argnames=("block_b", "mxu_bf16"))
def autoencoder_e2e_forward(x, params, *, block_b=DEFAULT_BLOCK_B, mxu_bf16=False):
    """params: flat tuple (We0, be0, We1, be1, Wd0, bd0, Wd1, bd1, Wc0, bc0, Wc1, bc1).

    Weights are (in_features, out_features); biases are (1, out_features).
    Returns (decoded, out, encoded) with shapes (B,32), (B,1), (B,8).
    """
    assert block_b % 8 == 0
    (we0, be0, we1, be1, wd0, bd0, wd1, bd1, wc0, bc0, wc1, bc1) = params
    f32 = jnp.float32

    # Fuse the two matmuls that consume `enc` into a single (8, 20) weight.
    wdc = jnp.concatenate([wd0, wc0], axis=1)                      # (8, 16 + 4)
    bdc = jnp.concatenate([bd0, bc0], axis=1)                      # (1, 20)
    # Fuse the two final matmuls into one block-diagonal (20, 33) weight.
    wdc1 = jnp.block([[wd1, jnp.zeros((LAYERS[1], 1), f32)],
                      [jnp.zeros((HIDDEN_CLS, LAYERS[0]), f32), wc1]])   # (20, 33)
    bdc1 = jnp.concatenate([bd1, bc1], axis=1)                     # (1, 33)

    if mxu_bf16:
        # bf16 MXU operands (f32 accumulate); biases and all VPU/EUP math stay f32.
        we0, we1, wdc, wdc1 = (w.astype(jnp.bfloat16) for w in (we0, we1, wdc, wdc1))
    fused_params = (we0, be0, we1, be1, wdc, bdc, wdc1, bdc1)

    B = x.shape[0]
    # Tile: large (amortize per-step overhead) but capped so the grid has >= 2 steps
    # whenever B > 8 (keeps both v7x TensorCores busy). No padding: ragged last block
    # is handled by Pallas partial-block DMA / masked writeback.
    tile_b = max(8, min(block_b, _round_up(pl.cdiv(B, 2), 8)))
    grid = (pl.cdiv(B, tile_b),)

    # x / outputs: tiled over batch.  Weights / biases: full block, constant index_map
    # -> DMA'd once and kept resident in VMEM across all grid steps.
    x_spec = pl.BlockSpec((tile_b, LAYERS[0]), lambda i: (i, 0))
    w_specs = [pl.BlockSpec(p.shape, lambda i: (0, 0)) for p in fused_params]
    out_specs = (
        pl.BlockSpec((tile_b, LAYERS[0]), lambda i: (i, 0)),       # decoded_loop
        pl.BlockSpec((tile_b, 1), lambda i: (i, 0)),               # out_loop
        pl.BlockSpec((tile_b, LAYERS[-1]), lambda i: (i, 0)),      # encoded_loop
    )
    out_shapes = (
        jax.ShapeDtypeStruct((B, LAYERS[0]), f32),
        jax.ShapeDtypeStruct((B, 1), f32),
        jax.ShapeDtypeStruct((B, LAYERS[-1]), f32),
    )

    matmul_flops = 2 * B * (LAYERS[0] * LAYERS[1]                       # 32x16 encoder 0
                            + LAYERS[1] * LAYERS[2]                     # 16x8  encoder 1
                            + LAYERS[2] * (LAYERS[1] + HIDDEN_CLS)      # fused 8x20
                            + (LAYERS[1] + HIDDEN_CLS) * (LAYERS[0] + 1))  # fused 20x33
    n_weight_elems = sum(int(p.size) for p in fused_params)
    bytes_accessed = 4 * (B * LAYERS[0]                                 # x read
                          + B * (LAYERS[0] + 1 + LAYERS[-1])            # outputs written
                          + n_weight_elems)
    cost = pl.CostEstimate(flops=matmul_flops,
                           transcendentals=B * LAYERS[0],               # sigmoid
                           bytes_accessed=bytes_accessed)

    # Only raise the scoped-VMEM limit if the per-step footprint approaches v5e's
    # 16 MiB default (double-buffered x + outputs, f32 intermediates).
    per_row_bytes = 4 * (2 * LAYERS[0]                                  # x (x2 buffers)
                         + 2 * (LAYERS[0] + 1 + LAYERS[-1])             # outputs (x2 buffers)
                         + (LAYERS[1] + LAYERS[2] + 20 + 33))           # h, enc, dc, y
    vmem_limit = 32 * 1024 * 1024 if tile_b * per_row_bytes > 12 * 1024 * 1024 else None

    dec, cls, enc = pl.pallas_call(
        functools.partial(_ae_kernel, mxu_bf16=mxu_bf16),
        out_shape=out_shapes,
        grid=grid,
        in_specs=[x_spec] + w_specs,
        out_specs=out_specs,
        compiler_params=pltpu.CompilerParams(
            dimension_semantics=("parallel",),
            vmem_limit_bytes=vmem_limit),
        cost_estimate=cost,
    )(x, *fused_params)

    return dec, cls, enc


def _init_linear(key, fan_in, fan_out):
    """Deterministic PyTorch-style uniform init; weight returned as (in, out)."""
    kw, kb = jax.random.split(key)
    bound = 1.0 / jnp.sqrt(jnp.float32(fan_in))
    w = jax.random.uniform(kw, (fan_in, fan_out), jnp.float32, -bound, bound)
    b = jax.random.uniform(kb, (1, fan_out), jnp.float32, -bound, bound)
    return w, b


def make_params(key):
    keys = jax.random.split(key, 6)
    # encoder: 32->16, 16->8
    we0, be0 = _init_linear(keys[0], LAYERS[0], LAYERS[1])
    we1, be1 = _init_linear(keys[1], LAYERS[1], LAYERS[2])
    # decoder: 8->16, 16->32
    wd0, bd0 = _init_linear(keys[2], LAYERS[2], LAYERS[1])
    wd1, bd1 = _init_linear(keys[3], LAYERS[1], LAYERS[0])
    # classifier (hidden): 8->4, 4->1
    wc0, bc0 = _init_linear(keys[4], LAYERS[-1], HIDDEN_CLS)
    wc1, bc1 = _init_linear(keys[5], HIDDEN_CLS, 1)
    return (we0, be0, we1, be1, wd0, bd0, wd1, bd1, wc0, bc0, wc1, bc1)


def _reference_forward(x, params):
    (we0, be0, we1, be1, wd0, bd0, wd1, bd1, wc0, bc0, wc1, bc1) = params
    h = jnp.maximum(x @ we0 + be0, 0.0)
    enc = jnp.maximum(h @ we1 + be1, 0.0)
    d = jnp.maximum(enc @ wd0 + bd0, 0.0)
    dec = jax.nn.sigmoid(d @ wd1 + bd1)
    c = jnp.maximum(enc @ wc0 + bc0, 0.0)
    cls = c @ wc1 + bc1
    return dec, cls, enc


if __name__ == "__main__":
    key = jax.random.PRNGKey(0)
    k_x, k_p = jax.random.split(key)

    # batch=300: tile_b = 152 (>=2 grid steps for v7x) with a ragged last block
    # (rows 300..303 are OOB-masked), exercising the no-pad / no-slice path.
    batch = 300
    x = jax.random.normal(k_x, (batch, LAYERS[0]), dtype=jnp.float32)
    params = make_params(k_p)

    dec, out, enc = autoencoder_e2e_forward(x, params)
    jax.block_until_ready((dec, out, enc))

    # sanity check against plain-JAX reference
    dec_r, out_r, enc_r = _reference_forward(x, params)
    assert dec.shape == (batch, LAYERS[0]) and out.shape == (batch, 1) and enc.shape == (batch, LAYERS[-1])
    assert jnp.allclose(dec, dec_r, atol=1e-5)
    assert jnp.allclose(out, out_r, atol=1e-5)
    assert jnp.allclose(enc, enc_r, atol=1e-5)

    # explicit small block: 3 grid steps, last block has a single valid row
    dec3, out3, enc3 = autoencoder_e2e_forward(x[:257], params, block_b=128)
    jax.block_until_ready((dec3, out3, enc3))
    assert jnp.allclose(dec3, dec_r[:257], atol=1e-5)
    assert jnp.allclose(out3, out_r[:257], atol=1e-5)
    assert jnp.allclose(enc3, enc_r[:257], atol=1e-5)

    # tiny batch: single-tile path
    dec2, out2, enc2 = autoencoder_e2e_forward(x[:8], params)
    jax.block_until_ready((dec2, out2, enc2))
    assert jnp.allclose(dec2, dec_r[:8], atol=1e-5)
    assert jnp.allclose(out2, out_r[:8], atol=1e-5)
    assert jnp.allclose(enc2, enc_r[:8], atol=1e-5)

    # bf16 MXU-operand path (f32 accumulate / f32 elementwise): looser tolerance
    decb, outb, encb = autoencoder_e2e_forward(x, params, mxu_bf16=True)
    jax.block_until_ready((decb, outb, encb))
    assert jnp.allclose(decb, dec_r, atol=5e-2)
    assert jnp.allclose(outb, out_r, atol=5e-2)
    assert jnp.allclose(encb, enc_r, atol=5e-2)

    print("KERNEL_OK")
</pallas_src>

<mosaic_0001>
module attributes {stable_mosaic.version = 11 : i64} {
  func.func @_ae_kernel(%arg0: i32, %arg1: memref<152x32xf32, #tpu.memory_space<vmem>>, %arg2: memref<32x16xf32, #tpu.memory_space<vmem>>, %arg3: memref<1x16xf32, #tpu.memory_space<vmem>>, %arg4: memref<16x8xf32, #tpu.memory_space<vmem>>, %arg5: memref<1x8xf32, #tpu.memory_space<vmem>>, %arg6: memref<8x20xf32, #tpu.memory_space<vmem>>, %arg7: memref<1x20xf32, #tpu.memory_space<vmem>>, %arg8: memref<20x33xf32, #tpu.memory_space<vmem>>, %arg9: memref<1x33xf32, #tpu.memory_space<vmem>>, %arg10: memref<152x32xf32, #tpu.memory_space<vmem>>, %arg11: memref<152x1xf32, #tpu.memory_space<vmem>>, %arg12: memref<152x8xf32, #tpu.memory_space<vmem>>) attributes {dimension_semantics = [#tpu.dimension_semantics<parallel>], iteration_bounds = array<i64: 2>, scalar_prefetch = 0 : i64, scratch_operands = 0 : i64, tpu.core_type = #tpu.core_type<tc>, window_params = [{transform_indices = @transform_0, window_bounds = array<i64: 152, 32>}, {pipeline_mode = #tpu.pipeline_mode<synchronous>, transform_indices = @transform_1, window_bounds = array<i64: 32, 16>}, {pipeline_mode = #tpu.pipeline_mode<synchronous>, transform_indices = @transform_2, window_bounds = array<i64: 1, 16>}, {pipeline_mode = #tpu.pipeline_mode<synchronous>, transform_indices = @transform_3, window_bounds = array<i64: 16, 8>}, {pipeline_mode = #tpu.pipeline_mode<synchronous>, transform_indices = @transform_4, window_bounds = array<i64: 1, 8>}, {pipeline_mode = #tpu.pipeline_mode<synchronous>, transform_indices = @transform_5, window_bounds = array<i64: 8, 20>}, {pipeline_mode = #tpu.pipeline_mode<synchronous>, transform_indices = @transform_6, window_bounds = array<i64: 1, 20>}, {pipeline_mode = #tpu.pipeline_mode<synchronous>, transform_indices = @transform_7, window_bounds = array<i64: 20, 33>}, {pipeline_mode = #tpu.pipeline_mode<synchronous>, transform_indices = @transform_8, window_bounds = array<i64: 1, 33>}, {transform_indices = @transform_9, window_bounds = array<i64: 152, 32>}, {transform_indices = @transform_10, window_bounds = array<i64: 152, 1>}, {transform_indices = @transform_11, window_bounds = array<i64: 152, 8>}]} {
    %c0 = arith.constant 0 : index
    %c0_0 = arith.constant 0 : index
    %0 = vector.load %arg1[%c0, %c0_0] : memref<152x32xf32, #tpu.memory_space<vmem>>, vector<152x32xf32>
    %c0_1 = arith.constant 0 : index
    %c0_2 = arith.constant 0 : index
    %1 = vector.load %arg2[%c0_1, %c0_2] : memref<32x16xf32, #tpu.memory_space<vmem>>, vector<32x16xf32>
    %cst = arith.constant dense<0.000000e+00> : vector<152x16xf32>
    %2 = tpu.matmul %0, %1, %cst {dimension_numbers = #tpu.dot_dimension_numbers<[1], [0], [0], [1], [0, 0, 1, 1], [], []>} : vector<152x32xf32>, vector<32x16xf32>, vector<152x16xf32> -> vector<152x16xf32>
    %c0_3 = arith.constant 0 : index
    %c0_4 = arith.constant 0 : index
    %3 = vector.load %arg3[%c0_3, %c0_4] : memref<1x16xf32, #tpu.memory_space<vmem>>, vector<1x16xf32>
    %4 = vector.broadcast %3 : vector<1x16xf32> to vector<152x16xf32>
    %5 = arith.addf %2, %4 : vector<152x16xf32>
    %cst_5 = arith.constant 0.000000e+00 : f32
    %6 = vector.broadcast %cst_5 : f32 to vector<152x16xf32>
    %7 = arith.maximumf %5, %6 : vector<152x16xf32>
    %c0_6 = arith.constant 0 : index
    %c0_7 = arith.constant 0 : index
    %8 = vector.load %arg4[%c0_6, %c0_7] : memref<16x8xf32, #tpu.memory_space<vmem>>, vector<16x8xf32>
    %cst_8 = arith.constant dense<0.000000e+00> : vector<152x8xf32>
    %9 = tpu.matmul %7, %8, %cst_8 {dimension_numbers = #tpu.dot_dimension_numbers<[1], [0], [0], [1], [0, 0, 1, 1], [], []>} : vector<152x16xf32>, vector<16x8xf32>, vector<152x8xf32> -> vector<152x8xf32>
    %c0_9 = arith.constant 0 : index
    %c0_10 = arith.constant 0 : index
    %10 = vector.load %arg5[%c0_9, %c0_10] : memref<1x8xf32, #tpu.memory_space<vmem>>, vector<1x8xf32>
    %11 = vector.broadcast %10 : vector<1x8xf32> to vector<152x8xf32>
    %12 = arith.addf %9, %11 : vector<152x8xf32>
    %cst_11 = arith.constant 0.000000e+00 : f32
    %13 = vector.broadcast %cst_11 : f32 to vector<152x8xf32>
    %14 = arith.maximumf %12, %13 : vector<152x8xf32>
    %c0_12 = arith.constant 0 : index
    %c0_13 = arith.constant 0 : index
    %15 = vector.load %arg6[%c0_12, %c0_13] : memref<8x20xf32, #tpu.memory_space<vmem>>, vector<8x20xf32>
    %cst_14 = arith.constant dense<0.000000e+00> : vector<152x20xf32>
    %16 = tpu.matmul %14, %15, %cst_14 {dimension_numbers = #tpu.dot_dimension_numbers<[1], [0], [0], [1], [0, 0, 1, 1], [], []>} : vector<152x8xf32>, vector<8x20xf32>, vector<152x20xf32> -> vector<152x20xf32>
    %c0_15 = arith.constant 0 : index
    %c0_16 = arith.constant 0 : index
    %17 = vector.load %arg7[%c0_15, %c0_16] : memref<1x20xf32, #tpu.memory_space<vmem>>, vector<1x20xf32>
    %18 = vector.broadcast %17 : vector<1x20xf32> to vector<152x20xf32>
    %19 = arith.addf %16, %18 : vector<152x20xf32>
    %cst_17 = arith.constant 0.000000e+00 : f32
    %20 = vector.broadcast %cst_17 : f32 to vector<152x20xf32>
    %21 = arith.maximumf %19, %20 : vector<152x20xf32>
    %c0_18 = arith.constant 0 : index
    %c0_19 = arith.constant 0 : index
    %22 = vector.load %arg8[%c0_18, %c0_19] : memref<20x33xf32, #tpu.memory_space<vmem>>, vector<20x33xf32>
    %cst_20 = arith.constant dense<0.000000e+00> : vector<152x33xf32>
    %23 = tpu.matmul %21, %22, %cst_20 {dimension_numbers = #tpu.dot_dimension_numbers<[1], [0], [0], [1], [0, 0, 1, 1], [], []>} : vector<152x20xf32>, vector<20x33xf32>, vector<152x33xf32> -> vector<152x33xf32>
    %c0_21 = arith.constant 0 : index
    %c0_22 = arith.constant 0 : index
    %24 = vector.load %arg9[%c0_21, %c0_22] : memref<1x33xf32, #tpu.memory_space<vmem>>, vector<1x33xf32>
    %25 = vector.broadcast %24 : vector<1x33xf32> to vector<152x33xf32>
    %26 = arith.addf %23, %25 : vector<152x33xf32>
    %27 = vector.extract_strided_slice %26 {offsets = [0, 0], sizes = [152, 32], strides = [1, 1]} : vector<152x33xf32> to vector<152x32xf32>
    %28 = arith.negf %27 : vector<152x32xf32>
    %29 = math.exp %28 : vector<152x32xf32>
    %cst_23 = arith.constant 1.000000e+00 : f32
    %30 = vector.broadcast %cst_23 : f32 to vector<152x32xf32>
    %31 = arith.addf %30, %29 : vector<152x32xf32>
    %32 = arith.divf %30, %31 : vector<152x32xf32>
    %33 = vector.extract_strided_slice %26 {offsets = [0, 32], sizes = [152, 1], strides = [1, 1]} : vector<152x33xf32> to vector<152x1xf32>
    %c0_24 = arith.constant 0 : index
    %c0_25 = arith.constant 0 : index
    %34 = vector.load %arg10[%c0_24, %c0_25] : memref<152x32xf32, #tpu.memory_space<vmem>>, vector<152x32xf32>
    tpu.vector_store %arg10[%c0_24, %c0_25], %32 {strides = array<i32>} : memref<152x32xf32, #tpu.memory_space<vmem>>, vector<152x32xf32>,
    %c0_26 = arith.constant 0 : index
    %c0_27 = arith.constant 0 : index
    %35 = vector.load %arg11[%c0_26, %c0_27] : memref<152x1xf32, #tpu.memory_space<vmem>>, vector<152x1xf32>
    tpu.vector_store %arg11[%c0_26, %c0_27], %33 {strides = array<i32>} : memref<152x1xf32, #tpu.memory_space<vmem>>, vector<152x1xf32>,
    %c0_28 = arith.constant 0 : index
    %c0_29 = arith.constant 0 : index
    %36 = vector.load %arg12[%c0_28, %c0_29] : memref<152x8xf32, #tpu.memory_space<vmem>>, vector<152x8xf32>
    tpu.vector_store %arg12[%c0_28, %c0_29], %14 {strides = array<i32>} : memref<152x8xf32, #tpu.memory_space<vmem>>, vector<152x8xf32>,
    return
  }
  func.func @transform_0(%arg0: i32) -> (i32, i32) {
    %c0_i32 = arith.constant 0 : i32
    %c0_i32_0 = arith.constant 0 : i32
    return %arg0, %c0_i32 : i32, i32
  }
  func.func @transform_1(%arg0: i32) -> (i32, i32) {
    %c0_i32 = arith.constant 0 : i32
    %c0_i32_0 = arith.constant 0 : i32
    %c0_i32_1 = arith.constant 0 : i32
    return %c0_i32, %c0_i32_0 : i32, i32
  }
  func.func @transform_2(%arg0: i32) -> (i32, i32) {
    %c0_i32 = arith.constant 0 : i32
    %c0_i32_0 = arith.constant 0 : i32
    %c0_i32_1 = arith.constant 0 : i32
    return %c0_i32, %c0_i32_0 : i32, i32
  }
  func.func @transform_3(%arg0: i32) -> (i32, i32) {
    %c0_i32 = arith.constant 0 : i32
    %c0_i32_0 = arith.constant 0 : i32
    %c0_i32_1 = arith.constant 0 : i32
    return %c0_i32, %c0_i32_0 : i32, i32
  }
  func.func @transform_4(%arg0: i32) -> (i32, i32) {
    %c0_i32 = arith.constant 0 : i32
    %c0_i32_0 = arith.constant 0 : i32
    %c0_i32_1 = arith.constant 0 : i32
    return %c0_i32, %c0_i32_0 : i32, i32
  }
  func.func @transform_5(%arg0: i32) -> (i32, i32) {
    %c0_i32 = arith.constant 0 : i32
    %c0_i32_0 = arith.constant 0 : i32
    %c0_i32_1 = arith.constant 0 : i32
    return %c0_i32, %c0_i32_0 : i32, i32
  }
  func.func @transform_6(%arg0: i32) -> (i32, i32) {
    %c0_i32 = arith.constant 0 : i32
    %c0_i32_0 = arith.constant 0 : i32
    %c0_i32_1 = arith.constant 0 : i32
    return %c0_i32, %c0_i32_0 : i32, i32
  }
  func.func @transform_7(%arg0: i32) -> (i32, i32) {
    %c0_i32 = arith.constant 0 : i32
    %c0_i32_0 = arith.constant 0 : i32
    %c0_i32_1 = arith.constant 0 : i32
    return %c0_i32, %c0_i32_0 : i32, i32
  }
  func.func @transform_8(%arg0: i32) -> (i32, i32) {
    %c0_i32 = arith.constant 0 : i32
    %c0_i32_0 = arith.constant 0 : i32
    %c0_i32_1 = arith.constant 0 : i32
    return %c0_i32, %c0_i32_0 : i32, i32
  }
  func.func @transform_9(%arg0: i32) -> (i32, i32) {
    %c0_i32 = arith.constant 0 : i32
    %c0_i32_0 = arith.constant 0 : i32
    return %arg0, %c0_i32 : i32, i32
  }
  func.func @transform_10(%arg0: i32) -> (i32, i32) {
    %c0_i32 = arith.constant 0 : i32
    %c0_i32_0 = arith.constant 0 : i32
    return %arg0, %c0_i32 : i32, i32
  }
  func.func @transform_11(%arg0: i32) -> (i32, i32) {
    %c0_i32 = arith.constant 0 : i32
    %c0_i32_0 = arith.constant 0 : i32
    return %arg0, %c0_i32 : i32, i32
  }
}

</mosaic_0001>

<bundles_post_ra>
// kernel: autoencoder_e2e_forward.1
= control target key start
LH: loop header
LB: loop body
LE: loop exit
PB: predicated region body
PF: predicated region fallthrough
CT: control target
= control target key end

     0   :  { %s2396_s17 = smov 0   ;;  %s2941_s0 = inlined_call_operand.vmem [shape: f32[300,32], index: 0, kind: input, shape index: {}]   ;;  %s2942_s1 = inlined_call_operand.vmem [shape: f32[32,16], index: 1, kind: input, shape index: {}]   ;;  %s2943_s2 = inlined_call_operand.vmem [shape: f32[1,16], index: 2, kind: input, shape index: {}]   ;;  %s2944_s3 = inlined_call_operand.vmem [shape: f32[16,8], index: 3, kind: input, shape index: {}]   ;;  %s2945_s4 = inlined_call_operand.vmem [shape: f32[1,8], index: 4, kind: input, shape index: {}]   ;;  %s2946_s5 = inlined_call_operand.vmem [shape: f32[8,20], index: 5, kind: input, shape index: {}]   ;;  %s2947_s6 = inlined_call_operand.vmem [shape: f32[1,20], index: 6, kind: input, shape index: {}]   ;;  %s2948_s7 = inlined_call_operand.vmem [shape: f32[20,33], index: 7, kind: input, shape index: {}]   ;;  %s2949_s8 = inlined_call_operand.vmem [shape: f32[1,33], index: 8, kind: input, shape index: {}]   ;;  %s2950_s9 = inlined_call_operand.vmem [shape: f32[300,32], index: 9, kind: output, shape index: {0}]   ;;  %s2951_s10 = inlined_call_operand.vmem [shape: f32[300,1], index: 10, kind: output, shape index: {1}]   ;;  %s2952_s11 = inlined_call_operand.vmem [shape: f32[300,8], index: 11, kind: output, shape index: {2}]  }
   0x1 LB: > { %s1779_s18 = sadd.s32 4294967295, %s2330_s17   ;;  %p1783_p0 = scmp.ge.s32.totalorder %s2330_s17, 1  ;;  %s2330_s17 = sphi %s2396_s17, %s22_s17  }
   0x2   : > { %p343_p1 = scmp.lt.s32.totalorder %s2330_s17, 3 }
   0x4   : > { %p344_p2 = pnand %p1783_p0, %p343_p1 }
   0x5   : > { %v436_v0 = vld [vmem:[%s2942_s1] sm:$0xff] (!%p344_p2)  ;;  %v437_v1 = vld [vmem:[%s2942_s1 + $0x8] sm:$0xff] (!%p344_p2)  ;;  %v438_v2 = vld [vmem:[%s2942_s1 + $0x10] sm:$0xff] (!%p344_p2)  ;;  %v2332_v3 = vmov (!%p344_p2), 0.0|0.0   ;;  %vm2333_vm0 = vmmov (!%p344_p2), 0   ;;  %v2334_v6 = vmov (!%p344_p2), 0.0  }
   0x6   : > { %347 = sbr.rel (%p344_p2) target bundleno = 1067 (0x42b), region = 56  ;;  %2224 = vmatprep.subr.bf16.mxu0 (!%p344_p2), %v2332_v3  ;;  %v2225_v4 = vpack.c.bf16 (!%p344_p2), %v437_v1, %v436_v0  ;;  %v439_v5 = vld [vmem:[%s2942_s1 + $0x18] sm:$0xff] (!%p344_p2)  ;;  %1984 = vmatprep.mubr.msk.f32.mxu0 (!%p344_p2), %vm2333_vm0, %v2334_v6  ;;  %vm447_vm1 = vcmask (!%p344_p2), 261120   ;;  %v684_v27 = vld [vmem:[%s2944_s3] sm:$0xff] (!%p344_p2)  ;;  %v685_v28 = vld [vmem:[%s2944_s3 + $0x8] sm:$0xff] (!%p344_p2)  ;;  %vm693_vm2 = vcmask (!%p344_p2), 130048  }
   0x7   : > { %s393_s27 = smul.u32 (!%p344_p2), 19, %s1779_s18  ;;  %2230 = vmatprep.subr.bf16.mxu1 (!%p344_p2), %v2332_v3  ;;  %2045 = vmatprep.mubr.msk.f32.mxu1 (!%p344_p2), %vm2333_vm0, %v2334_v6  ;;  %v2228_v7 = vpack.c.bf16 (!%p344_p2), %v439_v5, %v438_v2  ;;  %v2231_v29 = vpack.c.bf16 (!%p344_p2), %v685_v28, %v684_v27  ;;  %v2514_v30 = vld [vmem:[%s2943_s2] ss:$0 sm:$0xff] (!%p344_p2)  ;;  %vm1243_vm3 = vcmask (!%p344_p2), 1043456   ;;  %vm938_vm4 = vcmask (!%p344_p2), 64512   ;;  %s2335_s20 = smov (!%p344_p2), 96  }
   0x8   : > { %2226 = vmatpush3.bf16.msra.mxu0 (!%p344_p2), %v2225_v4  ;;  %v930_v35 = vld [vmem:[%s2946_s5] sm:$0xff] (!%p344_p2)  ;;  %vm1185_vm5 = vcmask (!%p344_p2), 162816   ;;  %vm1616_vm6 = vcmask (!%p344_p2), 7168  }
   0x9   : > { %p394_p3 = scmp.lt.s32.totalorder (!%p344_p2), %s393_s27, 37  ;;  %2227 = vmatprep.subr.bf16.mxu0 (!%p344_p2), %v2332_v3  ;;  %2232 = vmatpush3.bf16.msra.mxu1 (!%p344_p2), %v2231_v29 }
   0xa   : > { %2102 = vmatprep.subr.mxu1 (!%p344_p2), %v2334_v6 }
   0xc   : > { %2229 = vmatpush3.bf16.msra.mxu0 (!%p344_p2), %v2228_v7 }
   0xd   : > { %s2954_s27 = smov (!%p394_p3, %s393_s27), 37  ;;  %2233 = vmatprep.subr.bf16.mxu0 %v2332_v3 }
   0xe   : > { %s2420_s28 = sshll.u32 %s2954_s27, 3 }
   0xf   : > { %s2426_s12 = scalar_lea.vmem %s2941_s0, %s2420_s28  ;;  %s2615_s14 = scalar_lea.vmem %s2952_s11, %s2420_s28 }
  0x10   : > { %v417_v8 = vld [vmem:[%s2426_s12] sm:$0xff]  ;;  %v418_v9 = vld [vmem:[%s2426_s12 + $0x8] sm:$0xff]  ;;  %v419_v10 = vld [vmem:[%s2426_s12 + $0x10] sm:$0xff]  ;;  %s2829_s23 = scalar_lea.vmem %s2950_s9, %s2420_s28  ;;  %s2898_s26 = scalar_lea.vmem %s2951_s10, %s2420_s28 }
  0x11   : > { %1985 = vmatmul.mubr.msk.f32.vlgmr.msra.gmra.mrb[0].mxu0 %vm447_vm1, %v417_v8  ;;  %v420_v11 = vld [vmem:[%s2426_s12 + $0x18] sm:$0xff]  ;;  %v421_v12 = vld [vmem:[%s2426_s12 + $0x20] sm:$0xff]  ;;  %v422_v13 = vld [vmem:[%s2426_s12 + $0x28] sm:$0xff] }
  0x12   : > { %1987 = vmatprep.mubr.msk.f32.mxu0 %vm2333_vm0, %v2334_v6  ;;  %v423_v14 = vld [vmem:[%s2426_s12 + $0x30] sm:$0xff]  ;;  %v424_v15 = vld [vmem:[%s2426_s12 + $0x38] sm:$0xff]  ;;  %v425_v16 = vld [vmem:[%s2426_s12 + $0x40] sm:$0xff] }
  0x13   : > { %v426_v17 = vld [vmem:[%s2426_s12 + $0x48] sm:$0xff]  ;;  %v427_v18 = vld [vmem:[%s2426_s12 + $0x50] sm:$0xff]  ;;  %v428_v19 = vld [vmem:[%s2426_s12 + $0x58] sm:$0xff] }
  0x14   : > { %v429_v20 = vld [vmem:[%s2426_s12 + $0x60] sm:$0xff]  ;;  %v430_v21 = vld [vmem:[%s2426_s12 + $0x68] sm:$0xff]  ;;  %v431_v22 = vld [vmem:[%s2426_s12 + $0x70] sm:$0xff] }
  0x15   : > { %1988 = vmatmul.mubr.msk.f32.gmra.mrb[2].mxu0 %vm447_vm1, %v418_v9  ;;  %v432_v23 = vld [vmem:[%s2426_s12 + $0x78] sm:$0xff]  ;;  %v433_v24 = vld [vmem:[%s2426_s12 + $0x80] sm:$0xff]  ;;  %v434_v25 = vld [vmem:[%s2426_s12 + $0x88] sm:$0xff] }
  0x16   : > { %1990 = vmatprep.mubr.msk.f32.mxu0 %vm2333_vm0, %v2334_v6  ;;  %v435_v26 = vld [vmem:[%s2426_s12 + $0x90] sm:$0xff] }
  0x19   : > { %1991 = vmatmul.mubr.msk.f32.gmra.mrb[4].mxu0 %vm447_vm1, %v419_v10 }
  0x1a   : > { %1993 = vmatprep.mubr.msk.f32.mxu0 %vm2333_vm0, %v2334_v6 }
  0x1d   : > { %1994 = vmatmul.mubr.msk.f32.gmra.mrb[6].mxu0 %vm447_vm1, %v420_v11 }
  0x1e   : > { %1996 = vmatprep.mubr.msk.f32.mxu0 %vm2333_vm0, %v2334_v6 }
  0x21   : > { %1997 = vmatmul.mubr.msk.f32.gmra.mrb[8].mxu0 %vm447_vm1, %v421_v12 }
  0x22   : > { %1999 = vmatprep.mubr.msk.f32.mxu0 %vm2333_vm0, %v2334_v6 }
  0x25   : > { %2000 = vmatmul.mubr.msk.f32.gmra.mrb[10].mxu0 %vm447_vm1, %v422_v13 }
  0x26   : > { %2002 = vmatprep.mubr.msk.f32.mxu0 %vm2333_vm0, %v2334_v6 }
  0x29   : > { %2003 = vmatmul.mubr.msk.f32.gmra.mrb[12].mxu0 %vm447_vm1, %v423_v14 }
  0x2a   : > { %2005 = vmatprep.mubr.msk.f32.mxu0 %vm2333_vm0, %v2334_v6 }
  0x2d   : > { %2006 = vmatmul.mubr.msk.f32.gmra.mrb[14].mxu0 %vm447_vm1, %v424_v15 }
  0x2e   : > { %2008 = vmatprep.mubr.msk.f32.mxu0 %vm2333_vm0, %v2334_v6 }
  0x31   : > { %2009 = vmatmul.mubr.msk.f32.gmra.mrb[16].mxu0 %vm447_vm1, %v425_v16 }
  0x32   : > { %2011 = vmatprep.mubr.msk.f32.mxu0 %vm2333_vm0, %v2334_v6 }
  0x35   : > { %2012 = vmatmul.mubr.msk.f32.gmra.mrb[18].mxu0 %vm447_vm1, %v426_v17 }
  0x36   : > { %2014 = vmatprep.mubr.msk.f32.mxu0 %vm2333_vm0, %v2334_v6 }
  0x39   : > { %2015 = vmatmul.mubr.msk.f32.gmra.mrb[20].mxu0 %vm447_vm1, %v427_v18 }
  0x3a   : > { %2017 = vmatprep.mubr.msk.f32.mxu0 %vm2333_vm0, %v2334_v6 }
  0x3d   : > { %2018 = vmatmul.mubr.msk.f32.gmra.mrb[22].mxu0 %vm447_vm1, %v428_v19 }
  0x3e   : > { %2020 = vmatprep.mubr.msk.f32.mxu0 %vm2333_vm0, %v2334_v6 }
  0x41   : > { %2021 = vmatmul.mubr.msk.f32.gmra.mrb[24].mxu0 %vm447_vm1, %v429_v20 }
  0x42   : > { %2023 = vmatprep.mubr.msk.f32.mxu0 %vm2333_vm0, %v2334_v6 }
  0x45   : > { %2024 = vmatmul.mubr.msk.f32.gmra.mrb[26].mxu0 %vm447_vm1, %v430_v21 }
  0x46   : > { %2026 = vmatprep.mubr.msk.f32.mxu0 %vm2333_vm0, %v2334_v6 }
  0x49   : > { %2027 = vmatmul.mubr.msk.f32.gmra.mrb[28].mxu0 %vm447_vm1, %v431_v22 }
  0x4a   : > { %2029 = vmatprep.mubr.msk.f32.mxu0 %vm2333_vm0, %v2334_v6 }
  0x4d   : > { %2030 = vmatmul.mubr.msk.f32.gmra.mrb[30].mxu0 %vm447_vm1, %v432_v23 }
  0x4e   : > { %2032 = vmatprep.mubr.msk.f32.mxu0 %vm2333_vm0, %v2334_v6 }
  0x51   : > { %2033 = vmatmul.mubr.msk.f32.gmra.mrb[32].mxu0 %vm447_vm1, %v433_v24 }
  0x52   : > { %2035 = vmatprep.mubr.msk.f32.mxu0 %vm2333_vm0, %v2334_v6 }
  0x55   : > { %2036 = vmatmul.mubr.msk.f32.gmra.mrb[34].mxu0 %vm447_vm1, %v434_v25 }
  0x56   : > { %2038 = vmatprep.mubr.msk.f32.mxu0 %vm2333_vm0, %v2334_v6 }
  0x59   : > { %2039 = vmatmul.mubr.msk.f32.gmra.mrb[36].mxu0 %vm447_vm1, %v435_v26 }
  0x5a   : > { %2167 = vmatprep.mubr.msk.f32.mxu0 %vm2333_vm0, %v2334_v6 }
  0xe4   : > { %v571_v31 = vpop.f32.mrb[0].mxu0 }
  0xe5   : > { %v572_v32 = vadd.f32 %v2514_v30, %v571_v31  ;;  %v1986_v33 = vpop.f32.mrb[1].mxu0 }
  0xe7   : > { %v665_v34 = vmax.f32 %v572_v32, 0.0 }
  0xe8   : > { %v576_v36 = vpop.f32.mrb[2].mxu0 }
  0xe9   : > { %v577_v37 = vadd.f32 %v2514_v30, %v576_v36  ;;  %v1989_v38 = vpop.f32.mrb[3].mxu0  ;;  %2046 = vmatmul.mubr.msk.f32.vlgmr.msra.gmra.mrb[0].mxu1 %vm693_vm2, %v665_v34 }
  0xea   : > { %2048 = vmatprep.mubr.msk.f32.mxu1 %vm2333_vm0, %v2334_v6  ;;  %2103 = vmatpush3.msra.mxu1 %v930_v35 }
  0xeb   : > { %v666_v39 = vmax.f32 %v577_v37, 0.0 }
  0xec   : > { %v581_v40 = vpop.f32.mrb[4].mxu0 }
  0xed   : > { %v582_v41 = vadd.f32 %v2514_v30, %v581_v40  ;;  %v1992_v42 = vpop.f32.mrb[5].mxu0  ;;  %2049 = vmatmul.mubr.msk.f32.gmra.mrb[2].mxu1 %vm693_vm2, %v666_v39 }
  0xee   : > { %2051 = vmatprep.mubr.msk.f32.mxu1 %vm2333_vm0, %v2334_v6 }
  0xef   : > { %v667_v43 = vmax.f32 %v582_v41, 0.0 }
  0xf0   : > { %v586_v44 = vpop.f32.mrb[6].mxu0 }
  0xf1   : > { %v587_v45 = vadd.f32 %v2514_v30, %v586_v44  ;;  %v1995_v46 = vpop.f32.mrb[7].mxu0  ;;  %2052 = vmatmul.mubr.msk.f32.gmra.mrb[4].mxu1 %vm693_vm2, %v667_v43 }
  0xf2   : > { %2054 = vmatprep.mubr.msk.f32.mxu1 %vm2333_vm0, %v2334_v6  ;;  %v1175_v46 = vld [vmem:[%s2948_s7] sm:$0xff] }
  0xf3   : > { %v668_v47 = vmax.f32 %v587_v45, 0.0 }
  0xf4   : > { %v591_v48 = vpop.f32.mrb[8].mxu0 }
  0xf5   : > { %v592_v49 = vadd.f32 %v2514_v30, %v591_v48  ;;  %v1998_v50 = vpop.f32.mrb[9].mxu0  ;;  %2055 = vmatmul.mubr.msk.f32.gmra.mrb[6].mxu1 %vm693_vm2, %v668_v47  ;;  %v1177_v48 = vld [vmem:[%s2948_s7 + $0x10] sm:$0xf] }
  0xf6   : > { %2057 = vmatprep.mubr.msk.f32.mxu1 %vm2333_vm0, %v2334_v6 }
  0xf7   : > { %v669_v51 = vmax.f32 %v592_v49, 0.0  ;;  %v2608_v49 = vld [vmem:[%s2945_s4] ss:$0 sm:$0xff] }
  0xf8   : > { %v596_v52 = vpop.f32.mrb[10].mxu0 }
  0xf9   : > { %v597_v53 = vadd.f32 %v2514_v30, %v596_v52  ;;  %v2001_v54 = vpop.f32.mrb[11].mxu0  ;;  %2058 = vmatmul.mubr.msk.f32.gmra.mrb[8].mxu1 %vm693_vm2, %v669_v51 }
  0xfa   : > { %2060 = vmatprep.mubr.msk.f32.mxu1 %vm2333_vm0, %v2334_v6 }
  0xfb   : > { %v670_v55 = vmax.f32 %v597_v53, 0.0 }
  0xfc   : > { %v601_v56 = vpop.f32.mrb[12].mxu0 }
  0xfd   : > { %v602_v57 = vadd.f32 %v2514_v30, %v601_v56  ;;  %v2004_v58 = vpop.f32.mrb[13].mxu0  ;;  %2061 = vmatmul.mubr.msk.f32.gmra.mrb[10].mxu1 %vm693_vm2, %v670_v55 }
  0xfe   : > { %2063 = vmatprep.mubr.msk.f32.mxu1 %vm2333_vm0, %v2334_v6 }
  0xff   : > { %v671_v59 = vmax.f32 %v602_v57, 0.0 }
 0x100   : > { %v606_v60 = vpop.f32.mrb[14].mxu0 }
 0x101   : > { %v607_v61 = vadd.f32 %v2514_v30, %v606_v60  ;;  %v2007_v62 = vpop.f32.mrb[15].mxu0  ;;  %2064 = vmatmul.mubr.msk.f32.gmra.mrb[12].mxu1 %vm693_vm2, %v671_v59 }
 0x102   : > { %2066 = vmatprep.mubr.msk.f32.mxu1 %vm2333_vm0, %v2334_v6 }
 0x103   : > { %v672_v63 = vmax.f32 %v607_v61, 0.0 }
 0x104   : > { %v611_v0 = vpop.f32.mrb[16].mxu0 }
 0x105   : > { %v612_v1 = vadd.f32 %v2514_v30, %v611_v0  ;;  %v2010_v2 = vpop.f32.mrb[17].mxu0  ;;  %2067 = vmatmul.mubr.msk.f32.gmra.mrb[14].mxu1 %vm693_vm2, %v672_v63 }
 0x106   : > { %2069 = vmatprep.mubr.msk.f32.mxu1 %vm2333_vm0, %v2334_v6 }
 0x107   : > { %v673_v3 = vmax.f32 %v612_v1, 0.0 }
 0x108   : > { %v616_v4 = vpop.f32.mrb[18].mxu0 }
 0x109   : > { %v617_v5 = vadd.f32 %v2514_v30, %v616_v4  ;;  %v2013_v7 = vpop.f32.mrb[19].mxu0  ;;  %2070 = vmatmul.mubr.msk.f32.gmra.mrb[16].mxu1 %vm693_vm2, %v673_v3 }
 0x10a   : > { %2072 = vmatprep.mubr.msk.f32.mxu1 %vm2333_vm0, %v2334_v6 }
 0x10b   : > { %v674_v8 = vmax.f32 %v617_v5, 0.0 }
 0x10c   : > { %v621_v9 = vpop.f32.mrb[20].mxu0 }
 0x10d   : > { %v622_v10 = vadd.f32 %v2514_v30, %v621_v9  ;;  %v2016_v11 = vpop.f32.mrb[21].mxu0  ;;  %2073 = vmatmul.mubr.msk.f32.gmra.mrb[18].mxu1 %vm693_vm2, %v674_v8 }
 0x10e   : > { %2075 = vmatprep.mubr.msk.f32.mxu1 %vm2333_vm0, %v2334_v6 }
 0x10f   : > { %v675_v12 = vmax.f32 %v622_v10, 0.0 }
 0x110   : > { %v626_v13 = vpop.f32.mrb[22].mxu0 }
 0x111   : > { %v627_v14 = vadd.f32 %v2514_v30, %v626_v13  ;;  %v2019_v15 = vpop.f32.mrb[23].mxu0  ;;  %2076 = vmatmul.mubr.msk.f32.gmra.mrb[20].mxu1 %vm693_vm2, %v675_v12 }
 0x112   : > { %2078 = vmatprep.mubr.msk.f32.mxu1 %vm2333_vm0, %v2334_v6 }
 0x113   : > { %v676_v16 = vmax.f32 %v627_v14, 0.0 }
 0x114   : > { %v631_v17 = vpop.f32.mrb[24].mxu0 }
 0x115   : > { %v632_v18 = vadd.f32 %v2514_v30, %v631_v17  ;;  %v2022_v19 = vpop.f32.mrb[25].mxu0  ;;  %2079 = vmatmul.mubr.msk.f32.gmra.mrb[22].mxu1 %vm693_vm2, %v676_v16 }
 0x116   : > { %2081 = vmatprep.mubr.msk.f32.mxu1 %vm2333_vm0, %v2334_v6 }
 0x117   : > { %v677_v20 = vmax.f32 %v632_v18, 0.0 }
 0x118   : > { %v636_v21 = vpop.f32.mrb[26].mxu0 }
 0x119   : > { %v637_v22 = vadd.f32 %v2514_v30, %v636_v21  ;;  %v2025_v23 = vpop.f32.mrb[27].mxu0  ;;  %2082 = vmatmul.mubr.msk.f32.gmra.mrb[24].mxu1 %vm693_vm2, %v677_v20 }
 0x11a   : > { %2084 = vmatprep.mubr.msk.f32.mxu1 %vm2333_vm0, %v2334_v6 }
 0x11b   : > { %v678_v24 = vmax.f32 %v637_v22, 0.0 }
 0x11c   : > { %v641_v25 = vpop.f32.mrb[28].mxu0 }
 0x11d   : > { %v642_v26 = vadd.f32 %v2514_v30, %v641_v25  ;;  %v2028_v27 = vpop.f32.mrb[29].mxu0  ;;  %2085 = vmatmul.mubr.msk.f32.gmra.mrb[26].mxu1 %vm693_vm2, %v678_v24 }
 0x11e   : > { %2087 = vmatprep.mubr.msk.f32.mxu1 %vm2333_vm0, %v2334_v6 }
 0x11f   : > { %v679_v28 = vmax.f32 %v642_v26, 0.0 }
 0x120   : > { %v646_v29 = vpop.f32.mrb[30].mxu0 }
 0x121   : > { %v647_v31 = vadd.f32 %v2514_v30, %v646_v29  ;;  %v2031_v32 = vpop.f32.mrb[31].mxu0  ;;  %2088 = vmatmul.mubr.msk.f32.gmra.mrb[28].mxu1 %vm693_vm2, %v679_v28 }
 0x122   : > { %2090 = vmatprep.mubr.msk.f32.mxu1 %vm2333_vm0, %v2334_v6 }
 0x123   : > { %v680_v33 = vmax.f32 %v647_v31, 0.0 }
 0x124   : > { %v651_v34 = vpop.f32.mrb[32].mxu0 }
 0x125   : > { %v652_v35 = vadd.f32 %v2514_v30, %v651_v34  ;;  %v2034_v36 = vpop.f32.mrb[33].mxu0  ;;  %2091 = vmatmul.mubr.msk.f32.gmra.mrb[30].mxu1 %vm693_vm2, %v680_v33 }
 0x126   : > { %2093 = vmatprep.mubr.msk.f32.mxu1 %vm2333_vm0, %v2334_v6 }
 0x127   : > { %v681_v37 = vmax.f32 %v652_v35, 0.0 }
 0x128   : > { %v656_v38 = vpop.f32.mrb[34].mxu0 }
 0x129   : > { %v657_v39 = vadd.f32 %v2514_v30, %v656_v38  ;;  %v2037_v40 = vpop.f32.mrb[35].mxu0  ;;  %2094 = vmatmul.mubr.msk.f32.gmra.mrb[32].mxu1 %vm693_vm2, %v681_v37 }
 0x12a   : > { %2096 = vmatprep.mubr.msk.f32.mxu1 %vm2333_vm0, %v2334_v6 }
 0x12b   : > { %v682_v41 = vmax.f32 %v657_v39, 0.0 }
 0x12c   : > { %v661_v42 = vpop.f32.mrb[36].mxu0 }
 0x12d   : > { %v662_v43 = vadd.f32 %v2514_v30, %v661_v42  ;;  %v2040_v44 = vpop.f32.mrb[37].mxu0  ;;  %2097 = vmatmul.mubr.msk.f32.gmra.mrb[34].mxu1 %vm693_vm2, %v682_v41  ;;  %v1176_v30 = vld [vmem:[%s2948_s7 + $0x8] sm:$0xff] }
 0x12e   : > { %2099 = vmatprep.mubr.msk.f32.mxu1 %vm2333_vm0, %v2334_v6  ;;  %v2234_v47 = vpack.c.bf16 %v1176_v30, %v1175_v46 }
 0x12f   : > { %v683_v45 = vmax.f32 %v662_v43, 0.0 }
 0x130   : > { %2235 = vmatpush3.bf16.msra.mxu0 %v2234_v47 }
 0x131   : > { %2100 = vmatmul.mubr.msk.f32.gmra.mrb[36].mxu1 %vm693_vm2, %v683_v45  ;;  %2165 = vmatprep.subr.mxu0 %v2334_v6 }
 0x132   : > { %2104 = vmatprep.mubr.msk.f32.mxu1 %vm2333_vm0, %v2334_v6 }
 0x134   : > { %2166 = vmatpush3.msk.msra.mxu0 %vm1243_vm3, %v1177_v48 }
 0x1bc   : > { %v817_v50 = vpop.f32.mrb[0].mxu1 }
 0x1bd   : > { %v818_v51 = vadd.f32 %v2608_v49, %v817_v50  ;;  %v2047_v52 = vpop.f32.mrb[1].mxu1 }
 0x1bf   : > { %v911_v53 = vmax.f32 %v818_v51, 0.0 }
 0x1c0   : > { %v822_v54 = vpop.f32.mrb[2].mxu1 }
 0x1c1   : > { %1636 = vst.msk [vmem:[%s2615_s14] sm:$0xff] %vm938_vm4, %v911_v53  ;;  %v823_v55 = vadd.f32 %v2608_v49, %v822_v54  ;;  %v2050_v56 = vpop.f32.mrb[3].mxu1  ;;  %2105 = vmatmul.mubr.msk.f32.vlgmr.msra.gmra.mrb[38].mxu1 %vm938_vm4, %v911_v53 }
 0x1c2   : > { %2107 = vmatprep.mubr.msk.f32.mxu1 %vm2333_vm0, %v2334_v6 }
 0x1c3   : > { %v912_v57 = vmax.f32 %v823_v55, 0.0 }
 0x1c4   : > { %v827_v58 = vpop.f32.mrb[4].mxu1 }
 0x1c5   : > { %1637 = vst.msk [vmem:[%s2615_s14 + $0x8] sm:$0xff] %vm938_vm4, %v912_v57  ;;  %v828_v59 = vadd.f32 %v2608_v49, %v827_v58  ;;  %v2053_v60 = vpop.f32.mrb[5].mxu1  ;;  %2108 = vmatmul.mubr.msk.f32.gmra.mrb[40].mxu1 %vm938_vm4, %v912_v57 }
 0x1c6   : > { %2110 = vmatprep.mubr.msk.f32.mxu1 %vm2333_vm0, %v2334_v6 }
 0x1c7   : > { %v913_v61 = vmax.f32 %v828_v59, 0.0 }
 0x1c8   : > { %v832_v62 = vpop.f32.mrb[6].mxu1 }
 0x1c9   : > { %1638 = vst.msk [vmem:[%s2615_s14 + $0x10] sm:$0xff] %vm938_vm4, %v913_v61  ;;  %v833_v63 = vadd.f32 %v2608_v49, %v832_v62  ;;  %v2056_v0 = vpop.f32.mrb[7].mxu1  ;;  %2111 = vmatmul.mubr.msk.f32.gmra.mrb[42].mxu1 %vm938_vm4, %v913_v61 }
 0x1ca   : > { %2113 = vmatprep.mubr.msk.f32.mxu1 %vm2333_vm0, %v2334_v6  ;;  %v2731_v0 = vld [vmem:[%s2947_s6] ss:$0 sm:$0xff] }
 0x1cb   : > { %v914_v1 = vmax.f32 %v833_v63, 0.0 }
 0x1cc   : > { %v837_v2 = vpop.f32.mrb[8].mxu1 }
 0x1cd   : > { %1639 = vst.msk [vmem:[%s2615_s14 + $0x18] sm:$0xff] %vm938_vm4, %v914_v1  ;;  %v838_v3 = vadd.f32 %v2608_v49, %v837_v2  ;;  %v2059_v4 = vpop.f32.mrb[9].mxu1  ;;  %2114 = vmatmul.mubr.msk.f32.gmra.mrb[44].mxu1 %vm938_vm4, %v914_v1 }
 0x1ce   : > { %2116 = vmatprep.mubr.msk.f32.mxu1 %vm2333_vm0, %v2334_v6 }
 0x1cf   : > { %v915_v5 = vmax.f32 %v838_v3, 0.0 }
 0x1d0   : > { %v842_v7 = vpop.f32.mrb[10].mxu1 }
 0x1d1   : > { %1640 = vst.msk [vmem:[%s2615_s14 + $0x20] sm:$0xff] %vm938_vm4, %v915_v5  ;;  %v843_v8 = vadd.f32 %v2608_v49, %v842_v7  ;;  %v2062_v9 = vpop.f32.mrb[11].mxu1  ;;  %2117 = vmatmul.mubr.msk.f32.gmra.mrb[46].mxu1 %vm938_vm4, %v915_v5 }
 0x1d2   : > { %2119 = vmatprep.mubr.msk.f32.mxu1 %vm2333_vm0, %v2334_v6 }
 0x1d3   : > { %v916_v10 = vmax.f32 %v843_v8, 0.0 }
 0x1d4   : > { %v847_v11 = vpop.f32.mrb[12].mxu1 }
 0x1d5   : > { %1641 = vst.msk [vmem:[%s2615_s14 + $0x28] sm:$0xff] %vm938_vm4, %v916_v10  ;;  %v848_v12 = vadd.f32 %v2608_v49, %v847_v11  ;;  %v2065_v13 = vpop.f32.mrb[13].mxu1  ;;  %2120 = vmatmul.mubr.msk.f32.gmra.mrb[48].mxu1 %vm938_vm4, %v916_v10 }
 0x1d6   : > { %2122 = vmatprep.mubr.msk.f32.mxu1 %vm2333_vm0, %v2334_v6 }
 0x1d7   : > { %v917_v14 = vmax.f32 %v848_v12, 0.0 }
 0x1d8   : > { %v852_v15 = vpop.f32.mrb[14].mxu1 }
 0x1d9   : > { %1642 = vst.msk [vmem:[%s2615_s14 + $0x30] sm:$0xff] %vm938_vm4, %v917_v14  ;;  %v853_v16 = vadd.f32 %v2608_v49, %v852_v15  ;;  %v2068_v17 = vpop.f32.mrb[15].mxu1  ;;  %2123 = vmatmul.mubr.msk.f32.gmra.mrb[50].mxu1 %vm938_vm4, %v917_v14 }
 0x1da   : > { %2125 = vmatprep.mubr.msk.f32.mxu1 %vm2333_vm0, %v2334_v6 }
 0x1db   : > { %v918_v18 = vmax.f32 %v853_v16, 0.0 }
 0x1dc   : > { %v857_v19 = vpop.f32.mrb[16].mxu1 }
 0x1dd   : > { %1643 = vst.msk [vmem:[%s2615_s14 + $0x38] sm:$0xff] %vm938_vm4, %v918_v18  ;;  %v858_v20 = vadd.f32 %v2608_v49, %v857_v19  ;;  %v2071_v21 = vpop.f32.mrb[17].mxu1  ;;  %2126 = vmatmul.mubr.msk.f32.gmra.mrb[52].mxu1 %vm938_vm4, %v918_v18 }
 0x1de   : > { %2128 = vmatprep.mubr.msk.f32.mxu1 %vm2333_vm0, %v2334_v6 }
 0x1df   : > { %v919_v22 = vmax.f32 %v858_v20, 0.0 }
 0x1e0   : > { %v862_v23 = vpop.f32.mrb[18].mxu1 }
 0x1e1   : > { %1644 = vst.msk [vmem:[%s2615_s14 + $0x40] sm:$0xff] %vm938_vm4, %v919_v22  ;;  %v863_v24 = vadd.f32 %v2608_v49, %v862_v23  ;;  %v2074_v25 = vpop.f32.mrb[19].mxu1  ;;  %2129 = vmatmul.mubr.msk.f32.gmra.mrb[54].mxu1 %vm938_vm4, %v919_v22 }
 0x1e2   : > { %2131 = vmatprep.mubr.msk.f32.mxu1 %vm2333_vm0, %v2334_v6 }
 0x1e3   : > { %v920_v26 = vmax.f32 %v863_v24, 0.0 }
 0x1e4   : > { %v867_v27 = vpop.f32.mrb[20].mxu1 }
 0x1e5   : > { %1645 = vst.msk [vmem:[%s2615_s14 + $0x48] sm:$0xff] %vm938_vm4, %v920_v26  ;;  %v868_v28 = vadd.f32 %v2608_v49, %v867_v27  ;;  %v2077_v29 = vpop.f32.mrb[21].mxu1  ;;  %2132 = vmatmul.mubr.msk.f32.gmra.mrb[56].mxu1 %vm938_vm4, %v920_v26 }
 0x1e6   : > { %2134 = vmatprep.mubr.msk.f32.mxu1 %vm2333_vm0, %v2334_v6 }
 0x1e7   : > { %v921_v31 = vmax.f32 %v868_v28, 0.0 }
 0x1e8   : > { %v872_v32 = vpop.f32.mrb[22].mxu1 }
 0x1e9   : > { %1646 = vst.msk [vmem:[%s2615_s14 + $0x50] sm:$0xff] %vm938_vm4, %v921_v31  ;;  %v873_v33 = vadd.f32 %v2608_v49, %v872_v32  ;;  %v2080_v34 = vpop.f32.mrb[23].mxu1  ;;  %2135 = vmatmul.mubr.msk.f32.gmra.mrb[58].mxu1 %vm938_vm4, %v921_v31 }
 0x1ea   : > { %2137 = vmatprep.mubr.msk.f32.mxu1 %vm2333_vm0, %v2334_v6 }
 0x1eb   : > { %v922_v35 = vmax.f32 %v873_v33, 0.0 }
 0x1ec   : > { %v877_v36 = vpop.f32.mrb[24].mxu1 }
 0x1ed   : > { %1647 = vst.msk [vmem:[%s2615_s14 + $0x58] sm:$0xff] %vm938_vm4, %v922_v35  ;;  %v878_v37 = vadd.f32 %v2608_v49, %v877_v36  ;;  %v2083_v38 = vpop.f32.mrb[25].mxu1  ;;  %2138 = vmatmul.mubr.msk.f32.gmra.mrb[60].mxu1 %vm938_vm4, %v922_v35 }
 0x1ee   : > { %2140 = vmatprep.mubr.msk.f32.mxu1 %vm2333_vm0, %v2334_v6 }
 0x1ef   : > { %v923_v39 = vmax.f32 %v878_v37, 0.0 }
 0x1f0   : > { %v882_v40 = vpop.f32.mrb[26].mxu1 }
 0x1f1   : > { %1648 = vst.msk [vmem:[%s2615_s14 + $0x60] sm:$0xff] %vm938_vm4, %v923_v39  ;;  %v883_v41 = vadd.f32 %v2608_v49, %v882_v40  ;;  %v2086_v42 = vpop.f32.mrb[27].mxu1  ;;  %2141 = vmatmul.mubr.msk.f32.gmra.mrb[62].mxu1 %vm938_vm4, %v923_v39 }
 0x1f2   : > { %2143 = vmatprep.mubr.msk.f32.mxu1 %vm2333_vm0, %v2334_v6 }
 0x1f3   : > { %v924_v43 = vmax.f32 %v883_v41, 0.0 }
 0x1f4   : > { %v887_v44 = vpop.f32.mrb[28].mxu1 }
 0x1f5   : > { %1649 = vst.msk [vmem:[%s2615_s14 + $0x68] sm:$0xff] %vm938_vm4, %v924_v43  ;;  %v888_v45 = vadd.f32 %v2608_v49, %v887_v44  ;;  %v2089_v46 = vpop.f32.mrb[29].mxu1  ;;  %2144 = vmatmul.mubr.msk.f32.gmra.mrb[64].mxu1 %vm938_vm4, %v924_v43 }
 0x1f6   : > { %2146 = vmatprep.mubr.msk.f32.mxu1 %vm2333_vm0, %v2334_v6 }
 0x1f7   : > { %v925_v30 = vmax.f32 %v888_v45, 0.0 }
 0x1f8   : > { %v892_v47 = vpop.f32.mrb[30].mxu1 }
 0x1f9   : > { %1650 = vst.msk [vmem:[%s2615_s14 + $0x70] sm:$0xff] %vm938_vm4, %v925_v30  ;;  %v893_v48 = vadd.f32 %v2608_v49, %v892_v47  ;;  %v2092_v50 = vpop.f32.mrb[31].mxu1  ;;  %2147 = vmatmul.mubr.msk.f32.gmra.mrb[66].mxu1 %vm938_vm4, %v925_v30 }
 0x1fa   : > { %2149 = vmatprep.mubr.msk.f32.mxu1 %vm2333_vm0, %v2334_v6 }
 0x1fb   : > { %v926_v51 = vmax.f32 %v893_v48, 0.0 }
 0x1fc   : > { %v897_v52 = vpop.f32.mrb[32].mxu1 }
 0x1fd   : > { %1651 = vst.msk [vmem:[%s2615_s14 + $0x78] sm:$0xff] %vm938_vm4, %v926_v51  ;;  %v898_v53 = vadd.f32 %v2608_v49, %v897_v52  ;;  %v2095_v54 = vpop.f32.mrb[33].mxu1  ;;  %2150 = vmatmul.mubr.msk.f32.gmra.mrb[68].mxu1 %vm938_vm4, %v926_v51 }
 0x1fe   : > { %2152 = vmatprep.mubr.msk.f32.mxu1 %vm2333_vm0, %v2334_v6 }
 0x1ff   : > { %v927_v55 = vmax.f32 %v898_v53, 0.0 }
 0x200   : > { %v902_v56 = vpop.f32.mrb[34].mxu1 }
 0x201   : > { %1652 = vst.msk [vmem:[%s2615_s14 + $0x80] sm:$0xff] %vm938_vm4, %v927_v55  ;;  %v903_v57 = vadd.f32 %v2608_v49, %v902_v56  ;;  %v2098_v58 = vpop.f32.mrb[35].mxu1  ;;  %2153 = vmatmul.mubr.msk.f32.gmra.mrb[70].mxu1 %vm938_vm4, %v927_v55 }
 0x202   : > { %2155 = vmatprep.mubr.msk.f32.mxu1 %vm2333_vm0, %v2334_v6 }
 0x203   : > { %v928_v59 = vmax.f32 %v903_v57, 0.0 }
 0x204   : > { %v907_v60 = vpop.f32.mrb[36].mxu1 }
 0x205   : > { %1653 = vst.msk [vmem:[%s2615_s14 + $0x88] sm:$0xff] %vm938_vm4, %v928_v59  ;;  %v908_v61 = vadd.f32 %v2608_v49, %v907_v60  ;;  %v2101_v62 = vpop.f32.mrb[37].mxu1  ;;  %2156 = vmatmul.mubr.msk.f32.gmra.mrb[72].mxu1 %vm938_vm4, %v928_v59 }
 0x206   : > { %2158 = vmatprep.mubr.msk.f32.mxu1 %vm2333_vm0, %v2334_v6 }
 0x207   : > { %v929_v63 = vmax.f32 %v908_v61, 0.0 }
 0x209   : > { %1654 = vst.msk [vmem:[%s2615_s14 + $0x90] sm:$0xff] %vm938_vm4, %v929_v63  ;;  %2159 = vmatmul.mubr.msk.f32.gmra.mrb[74].mxu1 %vm938_vm4, %v929_v63 }
 0x294   : > { %v1062_v1 = vpop.f32.mrb[38].mxu1 }
 0x295   : > { %v1063_v2 = vadd.f32 %v2731_v0, %v1062_v1  ;;  %v2106_v49 = vpop.f32.mrb[39].mxu1 }
 0x297   : > { %v1156_v3 = vmax.f32 %v1063_v2, 0.0 }
 0x298   : > { %v1067_v4 = vpop.f32.mrb[40].mxu1 }
 0x299   : > { %v1068_v5 = vadd.f32 %v2731_v0, %v1067_v4  ;;  %v2109_v7 = vpop.f32.mrb[41].mxu1  ;;  %2168 = vmatmul.mubr.msk.f32.vlgmr.msra.gmra.mrb[38].mxu0 %vm1185_vm5, %v1156_v3 }
 0x29a   : > { %2170 = vmatprep.mubr.msk.f32.mxu0 %vm2333_vm0, %v2334_v6 }
 0x29b   : > { %v1157_v8 = vmax.f32 %v1068_v5, 0.0 }
 0x29c   : > { %v1072_v9 = vpop.f32.mrb[42].mxu1 }
 0x29d   : > { %v1073_v10 = vadd.f32 %v2731_v0, %v1072_v9  ;;  %v2112_v11 = vpop.f32.mrb[43].mxu1  ;;  %2171 = vmatmul.mubr.msk.f32.gmra.mrb[40].mxu0 %vm1185_vm5, %v1157_v8 }
 0x29e   : > { %2173 = vmatprep.mubr.msk.f32.mxu0 %vm2333_vm0, %v2334_v6 }
 0x29f   : > { %v1158_v12 = vmax.f32 %v1073_v10, 0.0 }
 0x2a0   : > { %v1077_v13 = vpop.f32.mrb[44].mxu1 }
 0x2a1   : > { %v1078_v14 = vadd.f32 %v2731_v0, %v1077_v13  ;;  %v2115_v15 = vpop.f32.mrb[45].mxu1  ;;  %2174 = vmatmul.mubr.msk.f32.gmra.mrb[42].mxu0 %vm1185_vm5, %v1158_v12 }
 0x2a2   : > { %2176 = vmatprep.mubr.msk.f32.mxu0 %vm2333_vm0, %v2334_v6  ;;  %v2810_v15 = vld [vmem:[%s2949_s8] ss:$0 sm:$0xff] }
 0x2a3   : > { %v1159_v16 = vmax.f32 %v1078_v14, 0.0 }
 0x2a4   : > { %v1082_v17 = vpop.f32.mrb[46].mxu1 }
 0x2a5   : > { %v1083_v18 = vadd.f32 %v2731_v0, %v1082_v17  ;;  %v2118_v19 = vpop.f32.mrb[47].mxu1  ;;  %2177 = vmatmul.mubr.msk.f32.gmra.mrb[44].mxu0 %vm1185_vm5, %v1159_v16 }
 0x2a6   : > { %2179 = vmatprep.mubr.msk.f32.mxu0 %vm2333_vm0, %v2334_v6 }
 0x2a7   : > { %v1160_v20 = vmax.f32 %v1083_v18, 0.0 }
 0x2a8   : > { %v1087_v21 = vpop.f32.mrb[48].mxu1 }
 0x2a9   : > { %v1088_v22 = vadd.f32 %v2731_v0, %v1087_v21  ;;  %v2121_v23 = vpop.f32.mrb[49].mxu1  ;;  %2180 = vmatmul.mubr.msk.f32.gmra.mrb[46].mxu0 %vm1185_vm5, %v1160_v20 }
 0x2aa   : > { %2182 = vmatprep.mubr.msk.f32.mxu0 %vm2333_vm0, %v2334_v6 }
 0x2ab   : > { %v1161_v24 = vmax.f32 %v1088_v22, 0.0 }
 0x2ac   : > { %v1092_v25 = vpop.f32.mrb[50].mxu1 }
 0x2ad   : > { %v1093_v26 = vadd.f32 %v2731_v0, %v1092_v25  ;;  %v2124_v27 = vpop.f32.mrb[51].mxu1  ;;  %2183 = vmatmul.mubr.msk.f32.gmra.mrb[48].mxu0 %vm1185_vm5, %v1161_v24 }
 0x2ae   : > { %2185 = vmatprep.mubr.msk.f32.mxu0 %vm2333_vm0, %v2334_v6 }
 0x2af   : > { %v1162_v28 = vmax.f32 %v1093_v26, 0.0 }
 0x2b0   : > { %v1097_v29 = vpop.f32.mrb[52].mxu1 }
 0x2b1   : > { %v1098_v31 = vadd.f32 %v2731_v0, %v1097_v29  ;;  %v2127_v32 = vpop.f32.mrb[53].mxu1  ;;  %2186 = vmatmul.mubr.msk.f32.gmra.mrb[50].mxu0 %vm1185_vm5, %v1162_v28 }
 0x2b2   : > { %2188 = vmatprep.mubr.msk.f32.mxu0 %vm2333_vm0, %v2334_v6 }
 0x2b3   : > { %v1163_v33 = vmax.f32 %v1098_v31, 0.0 }
 0x2b4   : > { %v1102_v34 = vpop.f32.mrb[54].mxu1 }
 0x2b5   : > { %v1103_v35 = vadd.f32 %v2731_v0, %v1102_v34  ;;  %v2130_v36 = vpop.f32.mrb[55].mxu1  ;;  %2189 = vmatmul.mubr.msk.f32.gmra.mrb[52].mxu0 %vm1185_vm5, %v1163_v33 }
 0x2b6   : > { %2191 = vmatprep.mubr.msk.f32.mxu0 %vm2333_vm0, %v2334_v6 }
 0x2b7   : > { %v1164_v37 = vmax.f32 %v1103_v35, 0.0 }
 0x2b8   : > { %v1107_v38 = vpop.f32.mrb[56].mxu1 }
 0x2b9   : > { %v1108_v39 = vadd.f32 %v2731_v0, %v1107_v38  ;;  %v2133_v40 = vpop.f32.mrb[57].mxu1  ;;  %2192 = vmatmul.mubr.msk.f32.gmra.mrb[54].mxu0 %vm1185_vm5, %v1164_v37 }
 0x2ba   : > { %2194 = vmatprep.mubr.msk.f32.mxu0 %vm2333_vm0, %v2334_v6 }
 0x2bb   : > { %v1165_v41 = vmax.f32 %v1108_v39, 0.0 }
 0x2bc   : > { %v1112_v42 = vpop.f32.mrb[58].mxu1 }
 0x2bd   : > { %v1113_v43 = vadd.f32 %v2731_v0, %v1112_v42  ;;  %v2136_v44 = vpop.f32.mrb[59].mxu1  ;;  %2195 = vmatmul.mubr.msk.f32.gmra.mrb[56].mxu0 %vm1185_vm5, %v1165_v41 }
 0x2be   : > { %2197 = vmatprep.mubr.msk.f32.mxu0 %vm2333_vm0, %v2334_v6 }
 0x2bf   : > { %v1166_v45 = vmax.f32 %v1113_v43, 0.0 }
 0x2c0   : > { %v1117_v46 = vpop.f32.mrb[60].mxu1 }
 0x2c1   : > { %v1118_v30 = vadd.f32 %v2731_v0, %v1117_v46  ;;  %v2139_v47 = vpop.f32.mrb[61].mxu1  ;;  %2198 = vmatmul.mubr.msk.f32.gmra.mrb[58].mxu0 %vm1185_vm5, %v1166_v45 }
 0x2c2   : > { %2200 = vmatprep.mubr.msk.f32.mxu0 %vm2333_vm0, %v2334_v6 }
 0x2c3   : > { %v1167_v48 = vmax.f32 %v1118_v30, 0.0 }
 0x2c4   : > { %v1122_v50 = vpop.f32.mrb[62].mxu1 }
 0x2c5   : > { %v1123_v51 = vadd.f32 %v2731_v0, %v1122_v50  ;;  %v2142_v52 = vpop.f32.mrb[63].mxu1  ;;  %2201 = vmatmul.mubr.msk.f32.gmra.mrb[60].mxu0 %vm1185_vm5, %v1167_v48 }
 0x2c6   : > { %2203 = vmatprep.mubr.msk.f32.mxu0 %vm2333_vm0, %v2334_v6 }
 0x2c7   : > { %v1168_v53 = vmax.f32 %v1123_v51, 0.0 }
 0x2c8   : > { %v1127_v54 = vpop.f32.mrb[64].mxu1 }
 0x2c9   : > { %v1128_v55 = vadd.f32 %v2731_v0, %v1127_v54  ;;  %v2145_v56 = vpop.f32.mrb[65].mxu1  ;;  %2204 = vmatmul.mubr.msk.f32.gmra.mrb[62].mxu0 %vm1185_vm5, %v1168_v53 }
 0x2ca   : > { %2206 = vmatprep.mubr.msk.f32.mxu0 %vm2333_vm0, %v2334_v6 }
 0x2cb   : > { %v1169_v57 = vmax.f32 %v1128_v55, 0.0 }
 0x2cc   : > { %v1132_v58 = vpop.f32.mrb[66].mxu1 }
 0x2cd   : > { %v1133_v59 = vadd.f32 %v2731_v0, %v1132_v58  ;;  %v2148_v60 = vpop.f32.mrb[67].mxu1  ;;  %2207 = vmatmul.mubr.msk.f32.gmra.mrb[64].mxu0 %vm1185_vm5, %v1169_v57 }
 0x2ce   : > { %2209 = vmatprep.mubr.msk.f32.mxu0 %vm2333_vm0, %v2334_v6 }
 0x2cf   : > { %v1170_v61 = vmax.f32 %v1133_v59, 0.0 }
 0x2d0   : > { %v1137_v62 = vpop.f32.mrb[68].mxu1 }
 0x2d1   : > { %v1138_v63 = vadd.f32 %v2731_v0, %v1137_v62  ;;  %v2151_v1 = vpop.f32.mrb[69].mxu1  ;;  %2210 = vmatmul.mubr.msk.f32.gmra.mrb[66].mxu0 %vm1185_vm5, %v1170_v61 }
 0x2d2   : > { %2212 = vmatprep.mubr.msk.f32.mxu0 %vm2333_vm0, %v2334_v6 }
 0x2d3   : > { %v1171_v2 = vmax.f32 %v1138_v63, 0.0 }
 0x2d4   : > { %v1142_v49 = vpop.f32.mrb[70].mxu1 }
 0x2d5   : > { %v1143_v3 = vadd.f32 %v2731_v0, %v1142_v49  ;;  %v2154_v4 = vpop.f32.mrb[71].mxu1  ;;  %2213 = vmatmul.mubr.msk.f32.gmra.mrb[68].mxu0 %vm1185_vm5, %v1171_v2 }
 0x2d6   : > { %2215 = vmatprep.mubr.msk.f32.mxu0 %vm2333_vm0, %v2334_v6 }
 0x2d7   : > { %v1172_v5 = vmax.f32 %v1143_v3, 0.0 }
 0x2d8   : > { %v1147_v7 = vpop.f32.mrb[72].mxu1 }
 0x2d9   : > { %v1148_v8 = vadd.f32 %v2731_v0, %v1147_v7  ;;  %v2157_v9 = vpop.f32.mrb[73].mxu1  ;;  %2216 = vmatmul.mubr.msk.f32.gmra.mrb[70].mxu0 %vm1185_vm5, %v1172_v5 }
 0x2da   : > { %2218 = vmatprep.mubr.msk.f32.mxu0 %vm2333_vm0, %v2334_v6 }
 0x2db   : > { %v1173_v10 = vmax.f32 %v1148_v8, 0.0 }
 0x2dc   : > { %v1152_v11 = vpop.f32.mrb[74].mxu1 }
 0x2dd   : > { %v1153_v12 = vadd.f32 %v2731_v0, %v1152_v11  ;;  %v2160_v13 = vpop.f32.mrb[75].mxu1  ;;  %2219 = vmatmul.mubr.msk.f32.gmra.mrb[72].mxu0 %vm1185_vm5, %v1173_v10 }
 0x2de   : > { %2221 = vmatprep.mubr.msk.f32.mxu0 %vm2333_vm0, %v2334_v6 }
 0x2df   : > { %v1174_v14 = vmax.f32 %v1153_v12, 0.0 }
 0x2e1   : > { %2222 = vmatmul.mubr.msk.f32.gmra.mrb[74].mxu0 %vm1185_vm5, %v1174_v14 }
 0x36c   : > { %v1313_v16 = vpop.f32.mrb[38].mxu0 }
 0x36d   : > { %v1314_v17 = vadd.f32 %v2810_v15, %v1313_v16  ;;  %v2169_v18 = vpop.f32.mrb[39].mxu0 }
 0x36f   : > { %v1869_v19 = vmul.f32 -1.442695, %v1314_v17  ;;  %1559 = vrot.lane.b32.xlu0 %v1314_v17, %s2335_s20 }
 0x370   : > { %v1318_v0 = vpop.f32.mrb[40].mxu0 }
 0x371   : > { %2248 = vpow2.f32 %v1869_v19  ;;  %v1319_v6 = vadd.f32 %v2810_v15, %v1318_v0  ;;  %v2172_v20 = vpop.f32.mrb[41].mxu0 }
 0x373   : > { %v1870_v21 = vmul.f32 -1.442695, %v1319_v6  ;;  %1561 = vrot.lane.b32.xlu0 %v1319_v6, %s2335_s20 }
 0x374   : > { %v1323_v22 = vpop.f32.mrb[42].mxu0 }
 0x375   : > { %2250 = vpow2.f32 %v1870_v21  ;;  %v1324_v23 = vadd.f32 %v2810_v15, %v1323_v22  ;;  %v2175_v24 = vpop.f32.mrb[43].mxu0 }
 0x377   : > { %v1871_v25 = vmul.f32 -1.442695, %v1324_v23  ;;  %1563 = vrot.lane.b32.xlu1 %v1324_v23, %s2335_s20 }
 0x378   : > { %v1328_v26 = vpop.f32.mrb[44].mxu0 }
 0x379   : > { %2252 = vpow2.f32 %v1871_v25  ;;  %v1329_v27 = vadd.f32 %v2810_v15, %v1328_v26  ;;  %v2178_v28 = vpop.f32.mrb[45].mxu0 }
 0x37b   : > { %v2249_v29 = vpop.eup %2248  ;;  %v1872_v31 = vmul.f32 -1.442695, %v1329_v27  ;;  %1565 = vrot.lane.b32.xlu1 %v1329_v27, %s2335_s20 }
 0x37c   : > { %v1464_v32 = vadd.f32 1.0, %v2249_v29  ;;  %v1333_v33 = vpop.f32.mrb[46].mxu0 }
 0x37d   : > { %2254 = vpow2.f32 %v1872_v31  ;;  %v1334_v34 = vadd.f32 %v2810_v15, %v1333_v33  ;;  %v2181_v35 = vpop.f32.mrb[47].mxu0 }
 0x37e   : > { %2256 = vrcp.f32 %v1464_v32 }
 0x37f   : > { %v2251_v36 = vpop.eup %2250  ;;  %v1873_v37 = vmul.f32 -1.442695, %v1334_v34  ;;  %1567 = vrot.lane.b32.xlu0 %v1334_v34, %s2335_s20 }
 0x380   : > { %v1465_v38 = vadd.f32 1.0, %v2251_v36  ;;  %v1338_v39 = vpop.f32.mrb[48].mxu0 }
 0x381   : > { %2258 = vpow2.f32 %v1873_v37  ;;  %v1339_v40 = vadd.f32 %v2810_v15, %v1338_v39  ;;  %v2184_v41 = vpop.f32.mrb[49].mxu0 }
 0x382   : > { %2260 = vrcp.f32 %v1465_v38 }
 0x383   : > { %v2253_v42 = vpop.eup %2252  ;;  %v1874_v43 = vmul.f32 -1.442695, %v1339_v40  ;;  %1569 = vrot.lane.b32.xlu1 %v1339_v40, %s2335_s20 }
 0x384   : > { %v1466_v44 = vadd.f32 1.0, %v2253_v42  ;;  %v1343_v45 = vpop.f32.mrb[50].mxu0 }
 0x385   : > { %2262 = vpow2.f32 %v1874_v43  ;;  %v1344_v46 = vadd.f32 %v2810_v15, %v1343_v45  ;;  %v2187_v30 = vpop.f32.mrb[51].mxu0 }
 0x386   : > { %2264 = vrcp.f32 %v1466_v44 }
 0x387   : > { %v2255_v47 = vpop.eup %2254  ;;  %v1875_v48 = vmul.f32 -1.442695, %v1344_v46  ;;  %1571 = vrot.lane.b32.xlu0 %v1344_v46, %s2335_s20 }
 0x388   : > { %v2257_v50 = vpop.eup %2256  ;;  %v1467_v51 = vadd.f32 1.0, %v2255_v47  ;;  %v1348_v52 = vpop.f32.mrb[52].mxu0 }
 0x389   : > { %1521 = vst.msk [vmem:[%s2829_s23] sm:$0xff] %vm447_vm1, %v2257_v50  ;;  %2266 = vpow2.f32 %v1875_v48  ;;  %v1349_v53 = vadd.f32 %v2810_v15, %v1348_v52  ;;  %v2190_v54 = vpop.f32.mrb[53].mxu0 }
 0x38a   : > { %2268 = vrcp.f32 %v1467_v51 }
 0x38b   : > { %v2259_v55 = vpop.eup %2258  ;;  %v1876_v56 = vmul.f32 -1.442695, %v1349_v53  ;;  %1573 = vrot.lane.b32.xlu1 %v1349_v53, %s2335_s20 }
 0x38c   : > { %v2261_v57 = vpop.eup %2260  ;;  %v1468_v58 = vadd.f32 1.0, %v2259_v55  ;;  %v1353_v59 = vpop.f32.mrb[54].mxu0 }
 0x38d   : > { %1522 = vst.msk [vmem:[%s2829_s23 + $0x8] sm:$0xff] %vm447_vm1, %v2261_v57  ;;  %2270 = vpow2.f32 %v1876_v56  ;;  %v1354_v60 = vadd.f32 %v2810_v15, %v1353_v59  ;;  %v2193_v61 = vpop.f32.mrb[55].mxu0 }
 0x38e   : > { %2272 = vrcp.f32 %v1468_v58 }
 0x38f   : > { %v2263_v62 = vpop.eup %2262  ;;  %v1877_v63 = vmul.f32 -1.442695, %v1354_v60  ;;  %1575 = vrot.lane.b32.xlu0 %v1354_v60, %s2335_s20 }
 0x390   : > { %v2265_v1 = vpop.eup %2264  ;;  %v1469_v2 = vadd.f32 1.0, %v2263_v62  ;;  %v1358_v49 = vpop.f32.mrb[56].mxu0 }
 0x391   : > { %1523 = vst.msk [vmem:[%s2829_s23 + $0x10] sm:$0xff] %vm447_vm1, %v2265_v1  ;;  %2274 = vpow2.f32 %v1877_v63  ;;  %v1359_v3 = vadd.f32 %v2810_v15, %v1358_v49  ;;  %v2196_v4 = vpop.f32.mrb[57].mxu0 }
 0x392   : > { %2276 = vrcp.f32 %v1469_v2 }
 0x393   : > { %v2267_v5 = vpop.eup %2266  ;;  %v1878_v7 = vmul.f32 -1.442695, %v1359_v3  ;;  %1577 = vrot.lane.b32.xlu1 %v1359_v3, %s2335_s20 }
 0x394   : > { %v2269_v8 = vpop.eup %2268  ;;  %v1470_v9 = vadd.f32 1.0, %v2267_v5  ;;  %v1363_v10 = vpop.f32.mrb[58].mxu0 }
 0x395   : > { %1524 = vst.msk [vmem:[%s2829_s23 + $0x18] sm:$0xff] %vm447_vm1, %v2269_v8  ;;  %2278 = vpow2.f32 %v1878_v7  ;;  %v1364_v11 = vadd.f32 %v2810_v15, %v1363_v10  ;;  %v2199_v12 = vpop.f32.mrb[59].mxu0 }
 0x396   : > { %2280 = vrcp.f32 %v1470_v9 }
 0x397   : > { %v2271_v13 = vpop.eup %2270  ;;  %v1879_v14 = vmul.f32 -1.442695, %v1364_v11  ;;  %1579 = vrot.lane.b32.xlu0 %v1364_v11, %s2335_s20 }
 0x398   : > { %v2273_v16 = vpop.eup %2272  ;;  %v1471_v17 = vadd.f32 1.0, %v2271_v13  ;;  %v1368_v18 = vpop.f32.mrb[60].mxu0 }
 0x399   : > { %1525 = vst.msk [vmem:[%s2829_s23 + $0x20] sm:$0xff] %vm447_vm1, %v2273_v16  ;;  %2282 = vpow2.f32 %v1879_v14  ;;  %v1369_v19 = vadd.f32 %v2810_v15, %v1368_v18  ;;  %v2202_v0 = vpop.f32.mrb[61].mxu0 }
 0x39a   : > { %2284 = vrcp.f32 %v1471_v17 }
 0x39b   : > { %v2275_v6 = vpop.eup %2274  ;;  %v1880_v20 = vmul.f32 -1.442695, %v1369_v19  ;;  %1581 = vrot.lane.b32.xlu1 %v1369_v19, %s2335_s20 }
 0x39c   : > { %v2277_v21 = vpop.eup %2276  ;;  %v1472_v22 = vadd.f32 1.0, %v2275_v6  ;;  %v1373_v23 = vpop.f32.mrb[62].mxu0 }
 0x39d   : > { %1526 = vst.msk [vmem:[%s2829_s23 + $0x28] sm:$0xff] %vm447_vm1, %v2277_v21  ;;  %2286 = vpow2.f32 %v1880_v20  ;;  %v1374_v24 = vadd.f32 %v2810_v15, %v1373_v23  ;;  %v2205_v25 = vpop.f32.mrb[63].mxu0 }
 0x39e   : > { %2288 = vrcp.f32 %v1472_v22 }
 0x39f   : > { %v2279_v26 = vpop.eup %2278  ;;  %v1881_v27 = vmul.f32 -1.442695, %v1374_v24  ;;  %1583 = vrot.lane.b32.xlu0 %v1374_v24, %s2335_s20 }
 0x3a0   : > { %v2281_v28 = vpop.eup %2280  ;;  %v1473_v29 = vadd.f32 1.0, %v2279_v26  ;;  %v1378_v31 = vpop.f32.mrb[64].mxu0 }
 0x3a1   : > { %1527 = vst.msk [vmem:[%s2829_s23 + $0x30] sm:$0xff] %vm447_vm1, %v2281_v28  ;;  %2290 = vpow2.f32 %v1881_v27  ;;  %v1379_v32 = vadd.f32 %v2810_v15, %v1378_v31  ;;  %v2208_v33 = vpop.f32.mrb[65].mxu0 }
 0x3a2   : > { %2292 = vrcp.f32 %v1473_v29 }
 0x3a3   : > { %v2283_v34 = vpop.eup %2282  ;;  %v1882_v35 = vmul.f32 -1.442695, %v1379_v32  ;;  %1585 = vrot.lane.b32.xlu1 %v1379_v32, %s2335_s20 }
 0x3a4   : > { %v2285_v36 = vpop.eup %2284  ;;  %v1474_v37 = vadd.f32 1.0, %v2283_v34  ;;  %v1383_v38 = vpop.f32.mrb[66].mxu0 }
 0x3a5   : > { %1528 = vst.msk [vmem:[%s2829_s23 + $0x38] sm:$0xff] %vm447_vm1, %v2285_v36  ;;  %2294 = vpow2.f32 %v1882_v35  ;;  %v1384_v39 = vadd.f32 %v2810_v15, %v1383_v38  ;;  %v2211_v40 = vpop.f32.mrb[67].mxu0 }
 0x3a6   : > { %2296 = vrcp.f32 %v1474_v37 }
 0x3a7   : > { %v2287_v41 = vpop.eup %2286  ;;  %v1883_v42 = vmul.f32 -1.442695, %v1384_v39  ;;  %1587 = vrot.lane.b32.xlu0 %v1384_v39, %s2335_s20 }
 0x3a8   : > { %v2289_v43 = vpop.eup %2288  ;;  %v1475_v44 = vadd.f32 1.0, %v2287_v41  ;;  %v1388_v45 = vpop.f32.mrb[68].mxu0 }
 0x3a9   : > { %1529 = vst.msk [vmem:[%s2829_s23 + $0x40] sm:$0xff] %vm447_vm1, %v2289_v43  ;;  %2298 = vpow2.f32 %v1883_v42  ;;  %v1389_v46 = vadd.f32 %v2810_v15, %v1388_v45  ;;  %v2214_v30 = vpop.f32.mrb[69].mxu0 }
 0x3aa   : > { %2300 = vrcp.f32 %v1475_v44 }
 0x3ab   : > { %v2291_v47 = vpop.eup %2290  ;;  %v1884_v48 = vmul.f32 -1.442695, %v1389_v46  ;;  %1589 = vrot.lane.b32.xlu1 %v1389_v46, %s2335_s20 }
 0x3ac   : > { %v2293_v50 = vpop.eup %2292  ;;  %v1476_v51 = vadd.f32 1.0, %v2291_v47  ;;  %v1393_v52 = vpop.f32.mrb[70].mxu0 }
 0x3ad   : > { %1530 = vst.msk [vmem:[%s2829_s23 + $0x48] sm:$0xff] %vm447_vm1, %v2293_v50  ;;  %2302 = vpow2.f32 %v1884_v48  ;;  %v1394_v53 = vadd.f32 %v2810_v15, %v1393_v52  ;;  %v2217_v54 = vpop.f32.mrb[71].mxu0 }
 0x3ae   : > { %2304 = vrcp.f32 %v1476_v51 }
 0x3af   : > { %v2295_v55 = vpop.eup %2294  ;;  %v1885_v56 = vmul.f32 -1.442695, %v1394_v53  ;;  %1591 = vrot.lane.b32.xlu0 %v1394_v53, %s2335_s20 }
 0x3b0   : > { %v2297_v57 = vpop.eup %2296  ;;  %v1477_v58 = vadd.f32 1.0, %v2295_v55  ;;  %v1398_v59 = vpop.f32.mrb[72].mxu0 }
 0x3b1   : > { %1531 = vst.msk [vmem:[%s2829_s23 + $0x50] sm:$0xff] %vm447_vm1, %v2297_v57  ;;  %2306 = vpow2.f32 %v1885_v56  ;;  %v1399_v60 = vadd.f32 %v2810_v15, %v1398_v59  ;;  %v2220_v61 = vpop.f32.mrb[73].mxu0 }
 0x3b2   : > { %2308 = vrcp.f32 %v1477_v58 }
 0x3b3   : > { %v2299_v62 = vpop.eup %2298  ;;  %v1886_v63 = vmul.f32 -1.442695, %v1399_v60  ;;  %1593 = vrot.lane.b32.xlu1 %v1399_v60, %s2335_s20 }
 0x3b4   : > { %v2301_v1 = vpop.eup %2300  ;;  %v1478_v2 = vadd.f32 1.0, %v2299_v62  ;;  %v1403_v49 = vpop.f32.mrb[74].mxu0 }
 0x3b5   : > { %1532 = vst.msk [vmem:[%s2829_s23 + $0x58] sm:$0xff] %vm447_vm1, %v2301_v1  ;;  %2310 = vpow2.f32 %v1886_v63  ;;  %v1404_v3 = vadd.f32 %v2810_v15, %v1403_v49  ;;  %v2223_v4 = vpop.f32.mrb[75].mxu0 }
 0x3b6   : > { %2312 = vrcp.f32 %v1478_v2 }
 0x3b7   : > { %v2303_v5 = vpop.eup %2302  ;;  %v1887_v7 = vmul.f32 -1.442695, %v1404_v3  ;;  %1595 = vrot.lane.b32.xlu0 %v1404_v3, %s2335_s20 }
 0x3b8   : > { %v2305_v8 = vpop.eup %2304  ;;  %v1479_v9 = vadd.f32 1.0, %v2303_v5 }
 0x3b9   : > { %1533 = vst.msk [vmem:[%s2829_s23 + $0x60] sm:$0xff] %vm447_vm1, %v2305_v8  ;;  %2314 = vpow2.f32 %v1887_v7 }
 0x3ba   : > { %2316 = vrcp.f32 %v1479_v9 }
 0x3bb   : > { %v2307_v10 = vpop.eup %2306 }
 0x3bc   : > { %v2309_v11 = vpop.eup %2308  ;;  %v1480_v12 = vadd.f32 1.0, %v2307_v10 }
 0x3bd   : > { %1534 = vst.msk [vmem:[%s2829_s23 + $0x68] sm:$0xff] %vm447_vm1, %v2309_v11 }
 0x3be   : > { %2318 = vrcp.f32 %v1480_v12 }
 0x3bf   : > { %v2311_v15 = vpop.eup %2310 }
 0x3c0   : > { %v2313_v13 = vpop.eup %2312  ;;  %v1481_v14 = vadd.f32 1.0, %v2311_v15 }
 0x3c1   : > { %1535 = vst.msk [vmem:[%s2829_s23 + $0x70] sm:$0xff] %vm447_vm1, %v2313_v13 }
 0x3c2   : > { %2320 = vrcp.f32 %v1481_v14 }
 0x3c3   : > { %v2315_v16 = vpop.eup %2314 }
 0x3c4   : > { %v2317_v17 = vpop.eup %2316  ;;  %v1482_v18 = vadd.f32 1.0, %v2315_v16 }
 0x3c5   : > { %1536 = vst.msk [vmem:[%s2829_s23 + $0x78] sm:$0xff] %vm447_vm1, %v2317_v17 }
 0x3c6   : > { %2322 = vrcp.f32 %v1482_v18 }
 0x3c8   : > { %v2319_v19 = vpop.eup %2318 }
 0x3c9   : > { %1537 = vst.msk [vmem:[%s2829_s23 + $0x80] sm:$0xff] %vm447_vm1, %v2319_v19 }
 0x3cc   : > { %v2321_v0 = vpop.eup %2320 }
 0x3cd   : > { %1538 = vst.msk [vmem:[%s2829_s23 + $0x88] sm:$0xff] %vm447_vm1, %v2321_v0 }
 0x3d0   : > { %v2323_v6 = vpop.eup %2322 }
 0x3d1   : > { %1539 = vst.msk [vmem:[%s2829_s23 + $0x90] sm:$0xff] %vm447_vm1, %v2323_v6 }
 0x3e1   : > { %v1560_v20 = vpop.permute.xlu0 %1559 }
 0x3e2   : > { %1617 = vst.msk [vmem:[%s2898_s26] sm:$0xff] %vm1616_vm6, %v1560_v20 }
 0x3e5   : > { %v1562_v21 = vpop.permute.xlu0 %1561 }
 0x3e6   : > { %1618 = vst.msk [vmem:[%s2898_s26 + $0x8] sm:$0xff] %vm1616_vm6, %v1562_v21 }
 0x3e9   : > { %v1564_v22 = vpop.permute.xlu1 %1563 }
 0x3ea   : > { %1619 = vst.msk [vmem:[%s2898_s26 + $0x10] sm:$0xff] %vm1616_vm6, %v1564_v22 }
 0x3ed   : > { %v1566_v23 = vpop.permute.xlu1 %1565 }
 0x3ee   : > { %1620 = vst.msk [vmem:[%s2898_s26 + $0x18] sm:$0xff] %vm1616_vm6, %v1566_v23 }
 0x3f1   : > { %v1568_v24 = vpop.permute.xlu0 %1567 }
 0x3f2   : > { %1621 = vst.msk [vmem:[%s2898_s26 + $0x20] sm:$0xff] %vm1616_vm6, %v1568_v24 }
 0x3f5   : > { %v1570_v25 = vpop.permute.xlu1 %1569 }
 0x3f6   : > { %1622 = vst.msk [vmem:[%s2898_s26 + $0x28] sm:$0xff] %vm1616_vm6, %v1570_v25 }
 0x3f9   : > { %v1572_v26 = vpop.permute.xlu0 %1571 }
 0x3fa   : > { %1623 = vst.msk [vmem:[%s2898_s26 + $0x30] sm:$0xff] %vm1616_vm6, %v1572_v26 }
 0x3fd   : > { %v1574_v27 = vpop.permute.xlu1 %1573 }
 0x3fe   : > { %1624 = vst.msk [vmem:[%s2898_s26 + $0x38] sm:$0xff] %vm1616_vm6, %v1574_v27 }
 0x401   : > { %v1576_v28 = vpop.permute.xlu0 %1575 }
 0x402   : > { %1625 = vst.msk [vmem:[%s2898_s26 + $0x40] sm:$0xff] %vm1616_vm6, %v1576_v28 }
 0x405   : > { %v1578_v29 = vpop.permute.xlu1 %1577 }
 0x406   : > { %1626 = vst.msk [vmem:[%s2898_s26 + $0x48] sm:$0xff] %vm1616_vm6, %v1578_v29 }
 0x409   : > { %v1580_v31 = vpop.permute.xlu0 %1579 }
 0x40a   : > { %1627 = vst.msk [vmem:[%s2898_s26 + $0x50] sm:$0xff] %vm1616_vm6, %v1580_v31 }
 0x40d   : > { %v1582_v32 = vpop.permute.xlu1 %1581 }
 0x40e   : > { %1628 = vst.msk [vmem:[%s2898_s26 + $0x58] sm:$0xff] %vm1616_vm6, %v1582_v32 }
 0x411   : > { %v1584_v33 = vpop.permute.xlu0 %1583 }
 0x412   : > { %1629 = vst.msk [vmem:[%s2898_s26 + $0x60] sm:$0xff] %vm1616_vm6, %v1584_v33 }
 0x415   : > { %v1586_v34 = vpop.permute.xlu1 %1585 }
 0x416   : > { %1630 = vst.msk [vmem:[%s2898_s26 + $0x68] sm:$0xff] %vm1616_vm6, %v1586_v34 }
 0x419   : > { %v1588_v35 = vpop.permute.xlu0 %1587 }
 0x41a   : > { %1631 = vst.msk [vmem:[%s2898_s26 + $0x70] sm:$0xff] %vm1616_vm6, %v1588_v35 }
 0x41d   : > { %v1590_v36 = vpop.permute.xlu1 %1589 }
 0x41e   : > { %1632 = vst.msk [vmem:[%s2898_s26 + $0x78] sm:$0xff] %vm1616_vm6, %v1590_v36 }
 0x421   : > { %v1592_v37 = vpop.permute.xlu0 %1591 }
 0x422   : > { %1633 = vst.msk [vmem:[%s2898_s26 + $0x80] sm:$0xff] %vm1616_vm6, %v1592_v37 }
 0x425   : > { %v1594_v38 = vpop.permute.xlu1 %1593 }
 0x426   : > { %1634 = vst.msk [vmem:[%s2898_s26 + $0x88] sm:$0xff] %vm1616_vm6, %v1594_v38 }
 0x429   : > { %v1596_v39 = vpop.permute.xlu0 %1595 }
 0x42a   : > { %1635 = vst.msk [vmem:[%s2898_s26 + $0x90] sm:$0xff] %vm1616_vm6, %v1596_v39 }
 0x42b PF: > { %s22_s17 = sadd.s32 1, %s2330_s17  }
 0x42c   : > { %p19_p4 = scmp.ge.s32.totalorder %s22_s17, 4  }
 0x42e   :  { %21 = sbr.rel (!%p19_p4) target bundleno = 1 (0x1), region = 110 }

</bundles_post_ra>
